<compile_context>
chip_gen: v5e
topology: v5e:2x2
jax: 0.10.0
libtpu: 0.0.40
codegen_flags: <defaults>
</compile_context>

<pallas_src>
import functools

import jax
import jax.numpy as jnp
from jax import lax
from jax.experimental import pallas as pl
from jax.experimental.pallas import tpu as pltpu

_BLOCK_BUDGET = 2 << 20  # ~2 MiB per streamed tile (Pallas double-buffers it)


def _round_up(x, m):
    return -(-x // m) * m


def _blocks_covering(lo, hi, bs):
    """Static block indices (block size bs) intersecting element range [lo, hi)."""
    return range(lo // bs, (hi - 1) // bs + 1)


def _row_border_kernel(rsched_ref, p_ref, out_ref, *, H, W, RB, TWA, bw):
    """Left/right border sums: rows [0,bw) and [H-bw,H), all columns.

    p_ref: (1, 1, RB, TWA) tile of y_pr[:, cl].
    out_ref: (1, 8, 128) per-batch partials (sublane 0 = left, 1 = right).
    """
    r = pl.program_id(1)
    w = pl.program_id(2)

    @pl.when(jnp.logical_and(r == 0, w == 0))
    def _():
        out_ref[...] = jnp.zeros(out_ref.shape, out_ref.dtype)

    p = p_ref[0, 0].astype(jnp.float32)                               # (RB, TWA)
    rows = rsched_ref[r] * RB + lax.broadcasted_iota(jnp.int32, (RB, 1), 0)
    cols = w * TWA + lax.broadcasted_iota(jnp.int32, (1, TWA), 1)
    col_ok = cols < W                                                 # padded-lane guard

    s_left = jnp.sum(jnp.where((rows < bw) & col_ok, p, 0.0))
    s_right = jnp.sum(jnp.where((rows >= H - bw) & (rows < H) & col_ok, p, 0.0))

    sub = lax.broadcasted_iota(jnp.int32, (8, 128), 0)
    out_ref[0] = out_ref[0] + (jnp.where(sub == 0, s_left, 0.0)
                               + jnp.where(sub == 1, s_right, 0.0))


def _col_border_kernel(csched_ref, p_ref, out_ref, *, H, W, TH, TW, bw):
    """Top/bottom border sums: cols [0,bw) and [W-bw,W), all rows.

    p_ref: (1, 1, TH, TW) tile of y_pr[:, cl].
    out_ref: (1, 8, 128) per-batch partials (sublane 0 = top, 1 = bottom).
    """
    c = pl.program_id(1)
    h = pl.program_id(2)

    @pl.when(jnp.logical_and(c == 0, h == 0))
    def _():
        out_ref[...] = jnp.zeros(out_ref.shape, out_ref.dtype)

    p = p_ref[0, 0].astype(jnp.float32)                               # (TH, TW)
    rows = h * TH + lax.broadcasted_iota(jnp.int32, (TH, 1), 0)
    cols = csched_ref[c] * TW + lax.broadcasted_iota(jnp.int32, (1, TW), 1)
    row_ok = rows < H                                                 # padded-row guard

    s_top = jnp.sum(jnp.where((cols < bw) & row_ok, p, 0.0))
    s_bottom = jnp.sum(jnp.where((cols >= W - bw) & (cols < W) & row_ok, p, 0.0))

    sub = lax.broadcasted_iota(jnp.int32, (8, 128), 0)
    out_ref[0] = out_ref[0] + (jnp.where(sub == 0, s_top, 0.0)
                               + jnp.where(sub == 1, s_bottom, 0.0))


def border_loss(y_pr, y_gt, img, true_class, *, weight, border_w, cl):
    """Forward pass of BorderLoss. y_gt / img / true_class are accepted for API
    parity with the PyTorch module but are unused by its forward."""
    del y_gt, img, true_class  # unused in the reference forward

    N, C, H, W = y_pr.shape
    bw = int(border_w)
    cl = int(cl)
    assert 0 < bw <= min(H, W), "border_w must be in [1, min(H, W)]"
    assert 0 <= cl < C
    itemsize = jnp.dtype(y_pr.dtype).itemsize

    # ---- call A: left/right row strips (full width, 8-aligned rows) ----
    RB = _round_up(bw, 8)
    if RB >= H:
        RB = H                                     # full dim -> always a legal block
    if W <= 128:
        TWA = W
    else:
        TWA = max(128, (_BLOCK_BUDGET // (RB * itemsize)) // 128 * 128)
        if TWA >= W:
            TWA = W
    n_wa = pl.cdiv(W, TWA)
    row_blocks = sorted(set(_blocks_covering(0, bw, RB)) |
                        set(_blocks_covering(H - bw, H, RB)))
    row_sched = jnp.asarray(row_blocks, dtype=jnp.int32)
    n_r = len(row_blocks)

    lr_cost = pl.CostEstimate(
        flops=4 * N * n_r * RB * n_wa * TWA, transcendentals=0,
        bytes_accessed=N * n_r * RB * n_wa * TWA * itemsize + N * 8 * 128 * 4)
    lr = pl.pallas_call(
        functools.partial(_row_border_kernel, H=H, W=W, RB=RB, TWA=TWA, bw=bw),
        out_shape=jax.ShapeDtypeStruct((N, 8, 128), jnp.float32),
        grid_spec=pltpu.PrefetchScalarGridSpec(
            num_scalar_prefetch=1,
            grid=(N, n_r, n_wa),
            in_specs=[pl.BlockSpec((1, 1, RB, TWA),
                                   lambda n, r, w, sched: (n, cl, sched[r], w))],
            out_specs=pl.BlockSpec((1, 8, 128), lambda n, r, w, sched: (n, 0, 0)),
        ),
        compiler_params=pltpu.CompilerParams(
            dimension_semantics=("parallel", "arbitrary", "arbitrary")),
        cost_estimate=lr_cost,
    )(row_sched, y_pr)

    # ---- call B: top/bottom column strips (128-lane wide, tall row tiles) ----
    TW = W if W <= 128 else 128
    if H * TW * itemsize <= _BLOCK_BUDGET:
        TH = H
    else:
        TH = min(H, max(8, (_BLOCK_BUDGET // (TW * itemsize)) // 8 * 8))
    n_h = pl.cdiv(H, TH)
    col_blocks = sorted(set(_blocks_covering(0, bw, TW)) |
                        set(_blocks_covering(W - bw, W, TW)))
    col_sched = jnp.asarray(col_blocks, dtype=jnp.int32)
    n_c = len(col_blocks)

    tb_cost = pl.CostEstimate(
        flops=4 * N * n_c * TW * n_h * TH, transcendentals=0,
        bytes_accessed=N * n_c * TW * n_h * TH * itemsize + N * 8 * 128 * 4)
    tb = pl.pallas_call(
        functools.partial(_col_border_kernel, H=H, W=W, TH=TH, TW=TW, bw=bw),
        out_shape=jax.ShapeDtypeStruct((N, 8, 128), jnp.float32),
        grid_spec=pltpu.PrefetchScalarGridSpec(
            num_scalar_prefetch=1,
            grid=(N, n_c, n_h),
            in_specs=[pl.BlockSpec((1, 1, TH, TW),
                                   lambda n, c, h, sched: (n, cl, h, sched[c]))],
            out_specs=pl.BlockSpec((1, 8, 128), lambda n, c, h, sched: (n, 0, 0)),
        ),
        compiler_params=pltpu.CompilerParams(
            dimension_semantics=("parallel", "arbitrary", "arbitrary")),
        cost_estimate=tb_cost,
    )(col_sched, y_pr)

    # Finalize (tiny) in the wrapper: batch-sum partials, convert to means.
    s_left = jnp.sum(lr[:, 0, 0])
    s_right = jnp.sum(lr[:, 1, 0])
    s_top = jnp.sum(tb[:, 0, 0])
    s_bottom = jnp.sum(tb[:, 1, 0])
    denom_rows = jnp.float32(N * bw * W)          # left / right element count
    denom_cols = jnp.float32(N * H * bw)          # top / bottom element count
    left = s_left / denom_rows
    right = s_right / denom_rows
    top = s_top / denom_cols
    bottom = s_bottom / denom_cols
    loss = ((left - 1.0) ** 2 + (right - 1.0) ** 2 +
            (top - 1.0) ** 2 + (bottom - 1.0) ** 2) / 4.0
    return jnp.float32(weight) * loss


def _reference_loss(y_pr, weight, border_w, cl):
    p = y_pr[:, cl].astype(jnp.float32)
    left = jnp.mean(p[:, 0:border_w, :])
    right = jnp.mean(p[:, -border_w:, :])
    top = jnp.mean(p[:, :, 0:border_w])
    bottom = jnp.mean(p[:, :, -border_w:])
    return jnp.float32(weight) * (((left - 1.0) ** 2 + (right - 1.0) ** 2 +
                                   (top - 1.0) ** 2 + (bottom - 1.0) ** 2) / 4.0)


if __name__ == "__main__":
    key = jax.random.PRNGKey(0)
    k1, k2, k3, k4 = jax.random.split(key, 4)

    # Primary small case (module-sized shapes).
    N, C, H, W = 2, 4, 16, 16
    WEIGHT, BORDER_W, CL = 0.5, 3, 1
    logits = jax.random.normal(k1, (N, C, H, W), dtype=jnp.float32)
    y_pr = jax.nn.softmax(logits, axis=1)                          # (N, C, H, W)
    y_gt = jax.random.randint(k2, (N, H, W), 0, C)                 # unused by forward
    img = jax.random.uniform(k3, (N, 3, H, W), dtype=jnp.float32)  # unused by forward

    loss = jax.block_until_ready(
        border_loss(y_pr, y_gt, img, CL, weight=WEIGHT, border_w=BORDER_W, cl=CL))
    ref = jax.block_until_ready(_reference_loss(y_pr, WEIGHT, BORDER_W, CL))
    assert jnp.allclose(loss, ref, rtol=1e-5, atol=1e-6), (loss, ref)

    # Secondary case exercising multi-block strip schedules and padded blocks.
    N2, C2, H2, W2 = 2, 3, 40, 272
    WEIGHT2, BW2, CL2 = 1.25, 5, 2
    logits2 = jax.random.normal(k4, (N2, C2, H2, W2), dtype=jnp.float32)
    y_pr2 = jax.nn.softmax(logits2, axis=1)
    loss2 = jax.block_until_ready(
        border_loss(y_pr2, None, None, CL2, weight=WEIGHT2, border_w=BW2, cl=CL2))
    ref2 = jax.block_until_ready(_reference_loss(y_pr2, WEIGHT2, BW2, CL2))
    assert jnp.allclose(loss2, ref2, rtol=1e-5, atol=1e-6), (loss2, ref2)

    print("KERNEL_OK")
</pallas_src>

<mosaic_0001>
module attributes {stable_mosaic.version = 11 : i64} {
  func.func @_row_border_kernel(%arg0: i32, %arg1: i32, %arg2: i32, %arg3: memref<2xi32, #tpu.memory_space<smem>>, %arg4: memref<1x1x8x16xf32, #tpu.memory_space<vmem>>, %arg5: memref<1x8x128xf32, #tpu.memory_space<vmem>>) attributes {dimension_semantics = [#tpu.dimension_semantics<parallel>, #tpu.dimension_semantics<arbitrary>, #tpu.dimension_semantics<arbitrary>], iteration_bounds = array<i64: 2, 2, 1>, scalar_prefetch = 1 : i64, scratch_operands = 0 : i64, tpu.core_type = #tpu.core_type<tc>, window_params = [{transform_indices = @transform_0, window_bounds = array<i64: 1, 1, 8, 16>}, {transform_indices = @transform_1, window_bounds = array<i64: 1, 8, 128>}]} {
    %c0_i32 = arith.constant 0 : i32
    %0 = arith.cmpi eq, %arg1, %c0_i32 : i32
    %c0_i32_0 = arith.constant 0 : i32
    %1 = arith.cmpi eq, %arg2, %c0_i32_0 : i32
    %2 = arith.andi %0, %1 : i1
    %3 = arith.extui %2 : i1 to i32
    %c0_i32_1 = arith.constant 0 : i32
    %4 = arith.cmpi ne, %3, %c0_i32_1 : i32
    scf.if %4 {
      %cst_19 = arith.constant 0.000000e+00 : f32
      %62 = vector.broadcast %cst_19 : f32 to vector<1x8x128xf32>
      %c0_20 = arith.constant 0 : index
      %c0_21 = arith.constant 0 : index
      %c0_22 = arith.constant 0 : index
      %63 = vector.load %arg5[%c0_20, %c0_21, %c0_22] : memref<1x8x128xf32, #tpu.memory_space<vmem>>, vector<1x8x128xf32>
      tpu.vector_store %arg5[%c0_20, %c0_21, %c0_22], %62 {strides = array<i32>} : memref<1x8x128xf32, #tpu.memory_space<vmem>>, vector<1x8x128xf32>,
    } else {
    }
    %c0 = arith.constant 0 : index
    %c0_2 = arith.constant 0 : index
    %c0_3 = arith.constant 0 : index
    %c0_4 = arith.constant 0 : index
    %5 = vector.load %arg4[%c0, %c0_2, %c0_3, %c0_4] : memref<1x1x8x16xf32, #tpu.memory_space<vmem>>, vector<1x1x8x16xf32>
    %6 = vector.shape_cast %5 : vector<1x1x8x16xf32> to vector<8x16xf32>
    %7 = arith.index_cast %arg1 : i32 to index
    %8 = memref.load %arg3[%7] : memref<2xi32, #tpu.memory_space<smem>>
    %c8_i32 = arith.constant 8 : i32
    %9 = arith.muli %8, %c8_i32 : i32
    %10 = tpu.iota {dimensions = array<i32: 0>} : vector<8x1xi32>
    %11 = vector.broadcast %9 : i32 to vector<8x1xi32>
    %12 = arith.addi %11, %10 : vector<8x1xi32>
    %c16_i32 = arith.constant 16 : i32
    %13 = arith.muli %arg2, %c16_i32 : i32
    %14 = tpu.iota {dimensions = array<i32: 1>} : vector<1x16xi32>
    %15 = vector.broadcast %13 : i32 to vector<1x16xi32>
    %16 = arith.addi %15, %14 : vector<1x16xi32>
    %c16_i32_5 = arith.constant 16 : i32
    %17 = vector.broadcast %c16_i32_5 : i32 to vector<1x16xi32>
    %18 = arith.cmpi slt, %16, %17 : vector<1x16xi32>
    %c3_i32 = arith.constant 3 : i32
    %19 = vector.broadcast %c3_i32 : i32 to vector<8x1xi32>
    %20 = arith.cmpi slt, %12, %19 : vector<8x1xi32>
    %21 = vector.broadcast %20 : vector<8x1xi1> to vector<8x16xi1>
    %22 = vector.broadcast %18 : vector<1x16xi1> to vector<8x16xi1>
    %23 = arith.andi %21, %22 : vector<8x16xi1>
    %cst = arith.constant 0.000000e+00 : f32
    %24 = vector.broadcast %cst : f32 to vector<8x16xf32>
    %25 = arith.select %23, %6, %24 : vector<8x16xi1>, vector<8x16xf32>
    %26 = vector.shape_cast %25 : vector<8x16xf32> to vector<1x8x16xf32>
    %cst_6 = arith.constant dense<0.000000e+00> : vector<1xf32>
    %27 = vector.multi_reduction <add>, %26, %cst_6 [1, 2] : vector<1x8x16xf32> to vector<1xf32>
    %28 = vector.shape_cast %27 : vector<1xf32> to vector<1x1x1xf32>
    %29 = vector.extract %28[0, 0, 0] : f32 from vector<1x1x1xf32>
    %c13_i32 = arith.constant 13 : i32
    %30 = vector.broadcast %c13_i32 : i32 to vector<8x1xi32>
    %31 = arith.cmpi sge, %12, %30 : vector<8x1xi32>
    %c16_i32_7 = arith.constant 16 : i32
    %32 = vector.broadcast %c16_i32_7 : i32 to vector<8x1xi32>
    %33 = arith.cmpi slt, %12, %32 : vector<8x1xi32>
    %34 = arith.andi %31, %33 : vector<8x1xi1>
    %35 = vector.broadcast %34 : vector<8x1xi1> to vector<8x16xi1>
    %36 = vector.broadcast %18 : vector<1x16xi1> to vector<8x16xi1>
    %37 = arith.andi %35, %36 : vector<8x16xi1>
    %cst_8 = arith.constant 0.000000e+00 : f32
    %38 = vector.broadcast %cst_8 : f32 to vector<8x16xf32>
    %39 = arith.select %37, %6, %38 : vector<8x16xi1>, vector<8x16xf32>
    %40 = vector.shape_cast %39 : vector<8x16xf32> to vector<1x8x16xf32>
    %cst_9 = arith.constant dense<0.000000e+00> : vector<1xf32>
    %41 = vector.multi_reduction <add>, %40, %cst_9 [1, 2] : vector<1x8x16xf32> to vector<1xf32>
    %42 = vector.shape_cast %41 : vector<1xf32> to vector<1x1x1xf32>
    %43 = vector.extract %42[0, 0, 0] : f32 from vector<1x1x1xf32>
    %44 = tpu.iota {dimensions = array<i32: 0>} : vector<8x128xi32>
    %c0_10 = arith.constant 0 : index
    %c0_11 = arith.constant 0 : index
    %c0_12 = arith.constant 0 : index
    %45 = vector.load %arg5[%c0_10, %c0_11, %c0_12] : memref<1x8x128xf32, #tpu.memory_space<vmem>>, vector<1x8x128xf32>
    %46 = vector.shape_cast %45 : vector<1x8x128xf32> to vector<8x128xf32>
    %c0_i32_13 = arith.constant 0 : i32
    %47 = vector.broadcast %c0_i32_13 : i32 to vector<8x128xi32>
    %48 = arith.cmpi eq, %44, %47 : vector<8x128xi32>
    %cst_14 = arith.constant 0.000000e+00 : f32
    %49 = vector.broadcast %29 : f32 to vector<8x128xf32>
    %50 = vector.broadcast %cst_14 : f32 to vector<8x128xf32>
    %51 = arith.select %48, %49, %50 : vector<8x128xi1>, vector<8x128xf32>
    %c1_i32 = arith.constant 1 : i32
    %52 = vector.broadcast %c1_i32 : i32 to vector<8x128xi32>
    %53 = arith.cmpi eq, %44, %52 : vector<8x128xi32>
    %cst_15 = arith.constant 0.000000e+00 : f32
    %54 = vector.broadcast %43 : f32 to vector<8x128xf32>
    %55 = vector.broadcast %cst_15 : f32 to vector<8x128xf32>
    %56 = arith.select %53, %54, %55 : vector<8x128xi1>, vector<8x128xf32>
    %57 = arith.addf %51, %56 : vector<8x128xf32>
    %58 = arith.addf %46, %57 : vector<8x128xf32>
    %c0_16 = arith.constant 0 : index
    %c0_17 = arith.constant 0 : index
    %c0_18 = arith.constant 0 : index
    %59 = vector.load %arg5[%c0_16, %c0_17, %c0_18] : memref<1x8x128xf32, #tpu.memory_space<vmem>>, vector<1x8x128xf32>
    %60 = vector.shape_cast %59 : vector<1x8x128xf32> to vector<8x128xf32>
    %61 = vector.shape_cast %58 : vector<8x128xf32> to vector<1x8x128xf32>
    tpu.vector_store %arg5[%c0_16, %c0_17, %c0_18], %61 {strides = array<i32>} : memref<1x8x128xf32, #tpu.memory_space<vmem>>, vector<1x8x128xf32>,
    return
  }
  func.func @transform_0(%arg0: i32, %arg1: i32, %arg2: i32, %arg3: memref<2xi32, #tpu.memory_space<smem>>) -> (i32, i32, i32, i32) {
    %0 = arith.index_cast %arg1 : i32 to index
    %1 = memref.load %arg3[%0] : memref<2xi32, #tpu.memory_space<smem>>
    %c1_i32 = arith.constant 1 : i32
    %c0_i32 = arith.constant 0 : i32
    return %arg0, %c1_i32, %1, %arg2 : i32, i32, i32, i32
  }
  func.func @transform_1(%arg0: i32, %arg1: i32, %arg2: i32, %arg3: memref<2xi32, #tpu.memory_space<smem>>) -> (i32, i32, i32) {
    %c0_i32 = arith.constant 0 : i32
    %c0_i32_0 = arith.constant 0 : i32
    %c0_i32_1 = arith.constant 0 : i32
    return %arg0, %c0_i32, %c0_i32_0 : i32, i32, i32
  }
}

</mosaic_0001>

<bundles_post_ra>
// kernel: tpu_custom_call.1
= control target key start
LH: loop header
LB: loop body
LE: loop exit
PB: predicated region body
PF: predicated region fallthrough
CT: control target
= control target key end

     0   :  { %s640_s12 = smov [#allocation3]   ;;  %s857_s0 = inlined_call_operand.hbm [shape: s32[2], index: 0, kind: input, shape index: {}]   ;;  %s858_s1 = inlined_call_operand.hbm [shape: f32[2,4,16,16], index: 1, kind: input, shape index: {}]   ;;  %s859_s2 = inlined_call_operand.hbm [shape: f32[2,8,128], index: 2, kind: output, shape index: {}]  }
   0x1   :  { %s8_s11 = sshll.u32 %s857_s0, 4  ;;  %s9_s11 = int_to_ptr.hbm [resolvable:$true] %s8_s11 }
   0x2   :  { %11 = dma.hbm_to_smem %s9_s11, 16, %s640_s12, [#allocation2] }
   0x3   :  { %586 = dma.done.wait [#allocation2], 16 }
   0x4   :  { %587 = vsyncadd [#allocation2], 4294967280 }
   0x5   :  { %14 = sfence }
   0x6   :  { %15 = vsyncpa [#allocation5], 0 }
   0x7   :  { %17 = vsyncpa [#allocation5 + $0x1], 0 }
   0x8   :  { %18 = vsyncpa [#allocation6], 0 }
   0x9   :  { %20 = vsyncpa [#allocation6 + $0x1], 0  ;;  %s660_s13 = smov 0   ;;  %s662_s14 = smov 0  }
   0xa   :  { %s664_s15 = smov 0   ;;  %s666_s16 = smov 0  }
   0xb   :  { %s668_s17 = smov 0   ;;  %s670_s0 = smov 0  }
   0xc   :  { %s672_s18 = smov 0   ;;  %s674_s19 = smov 0  }
   0xd   :  { %s676_s20 = smov 0   ;;  %s678_s21 = smov 0  }
   0xe   :  { %s680_s22 = smov 0  }
   0xf LB: > { %865 = sst [smem:[#allocation13_spill]] %s618_s0  ;;  %s343_s23 = sadd.s32 4294967295, %s638_s22   ;;  %s638_s22 = sphi %s680_s22, %s26_s22   ;;  %s634_s21 = sphi %s678_s21, %s881_s21   ;;  %s630_s20 = sphi %s676_s20, %s880_s20   ;;  %s626_s19 = sphi %s674_s19, %s879_s19   ;;  %s622_s18 = sphi %s672_s18, %s878_s18   ;;  %s618_s0 = sphi %s670_s0, %s877_s0   ;;  %s614_s17 = sphi %s668_s17, %s886_s17   ;;  %s610_s16 = sphi %s666_s16, %s885_s16   ;;  %s606_s15 = sphi %s664_s15, %s884_s15   ;;  %s602_s14 = sphi %s662_s14, %s883_s14   ;;  %s598_s13 = sphi %s660_s13, %s882_s13  }
  0x10   : > { %866 = sst [smem:[#allocation14_spill]] %s630_s20  ;;  %s344_s24 = sadd.s32 4294967294, %s638_s22  }
  0x11   : > { %867 = sst [smem:[#allocation15_spill]] %s634_s21  ;;  %s41_s25 = sadd.s32 1, %s630_s20 }
  0x12   : > { %p43_p0 = scmp.ge.s32.totalorder %s41_s25, 2  ;;  %s45_s26 = sadd.s32 1, %s634_s21 }
  0x13   : > { %s49_s27 = sld [smem:[#allocation3 + %s630_s20]]  ;;  %s58_s28 = sadd.s32 1, %s618_s0 }
  0x14   : > { %s888_s25 = smov (%p43_p0, %s41_s25), 0  ;;  %s890_s26 = smov (!%p43_p0, %s45_s26), %s634_s21 }
  0x15   : > { %868 = sst [smem:[#allocation16_spill]] %s888_s25  ;;  %p65_p1 = scmp.ne.s32.totalorder %s618_s0, %s614_s17 }
  0x16   : > { %s50_s29 = sld [smem:[#allocation3 + %s888_s25]]  ;;  %p47_p2 = scmp.ge.s32.totalorder %s890_s26, 2 }
  0x17   : > { %p71_p3 = scmp.ne.s32.totalorder %s614_s17, %s610_s16  ;;  %p66_p4 = scmp.eq.s32.totalorder %s638_s22, 0 }
  0x18   : > { %p72_p5 = scmp.eq.s32.totalorder %s343_s23, 0  ;;  %s892_s26 = smov (%p47_p2, %s890_s26), 0 }
  0x19   : > { %869 = sst [smem:[#allocation17_spill]] %s892_s26  ;;  %s84_s3 = sadd.s32 1, %s606_s15 }
  0x1a   : > { %p729_p6 = por %p72_p5, %p71_p3  ;;  %s51_s4 = ssub.s32 %s634_s21, %s892_s26 }
  0x1b   : > { %p94_p7 = scmp.ne.s32.totalorder %s606_s15, %s602_s14  ;;  %p82_p8 = scmp.eq.s32.totalorder %s51_s4, 0 }
  0x1c   : > { %s52_s5 = ssub.s32 %s49_s27, %s50_s29  ;;  %p95_p9 = scmp.eq.s32.totalorder %s343_s23, 3 }
  0x1d   : > { %s53_s6 = sor.u32 %s52_s5, %s51_s4  ;;  %p100_p11 = scmp.ne.s32.totalorder %s602_s14, %s598_s13 }
  0x1e   : > { %p56_p10 = scmp.eq.s32.totalorder %s53_s6, 0  ;;  %p746_p12 = por %p95_p9, %p94_p7 }
  0x1f   : > { %s741_s7 = scalar_select %p82_p8, %s606_s15, %s84_s3  }
  0x20   : > { %s744_s8 = scalar_select %p56_p10, %s618_s0, %s58_s28  }
  0x21   : > { %p101_p13 = scmp.eq.s32.totalorder %s344_s24, 3  ;;  %p67_p0 = por %p66_p4, %p65_p1 }
  0x22   : > { %871 = sst [smem:[#allocation18_spill]] %s744_s8  ;;  %p380_p3 = scmp.lt.s32.totalorder %s638_s22, 4 }
  0x23   : > { %p755_p2 = por %p101_p13, %p100_p11  ;;  %s121_s11 = sand.u32 1, %s618_s0  }
  0x24   : > { %s364_s12 = scalar_select %p67_p0, [#allocation3], [#allocation8] }
  0x25   : > { %s365_s16 = scalar_select %p67_p0, %s630_s20, 0 }
  0x26   : > { %s894_s12 = smov (!%p380_p3, %s364_s12), [#allocation9]  ;;  %p762_p5 = pnand %p380_p3, %p67_p0 }
  0x27   : > { %s896_s16 = smov (!%p380_p3, %s365_s16), 0  ;;  %s347_s27 = sshll.u32 %s121_s11, 3 }
  0x28   : > { %s126_s28 = sld [smem:[%s894_s12 + %s896_s16]]  ;;  %p350_p7 = scmp.ge.s32.totalorder %s638_s22, 1 }
  0x29   : > { %p143_p8 = scmp.lt.s32.totalorder %s638_s22, 5  ;;  %s348_s24 = sshll.u32 %s634_s21, 3 }
  0x2a   : > { %s125_s4 = scalar_lea.vmem [#allocation4], %s347_s27  ;;  %s122_s12 = scalar_lea.sflag [#allocation5], %s121_s11 }
  0x2b   : > { %p769_p1 = pnand %p350_p7, %p143_p8  ;;  %s138_s5 = sshll.u32 %s125_s4, 4  ;;  %s139_s5 = int_to_ptr.vmem [resolvable:$true] %s138_s5 }
  0x2c   : > { %p488_p9 = pneg %p762_p5 }
  0x2e   : > { %s284_s3 = sadd.s32 %s348_s24, %s126_s28  ;;  %s491_s24 = scalar_lea.hbm %s858_s1, 128 }
  0x2f   : > { %s349_s6 = sshll.u32 %s284_s3, 3 }
  0x30   : > { %s286_s20 = scalar_lea.hbm %s858_s1, %s349_s6 }
  0x31   : > { %s287_s8 = scalar_lea.hbm %s286_s20, 16 }
  0x32   : > { %s136_s0 = sshll.u32 %s287_s8, 4  ;;  %s137_s0 = int_to_ptr.hbm [resolvable:$true] %s136_s0 }
  0x33   : > { %s484_s16 = sshra.s32 %s137_s0, 4  ;;  %s485_s16 = int_to_ptr.hbm [resolvable:$true] %s484_s16 }
  0x34   : > { %s486_s21 = scalar_lea.hbm %s485_s16, 8  ;;  %p492_p13 = scmp.lt.s32.totalorder %s485_s16, %s858_s1 }
  0x35   : > { %p487_p4 = scmp.ne.s32.totalorder %s485_s16, %s486_s21  ;;  %p493_p0 = scmp.lt.s32.totalorder %s491_s24, %s486_s21 }
  0x37   : > { %p489_p10 = pnand %p488_p9, %p487_p4  ;;  %p494_p3 = por %p493_p0, %p492_p13 }
  0x39   : > { %p490_p11 = pneg %p489_p10 }
  0x3b   : > { %p495_p7 = pnand %p494_p3, %p490_p11 }
  0x3d   : > { %498 = shalt.err (!%p495_p7)
}
  0x3e   : > { %375 = dma.hbm_to_vmem [thread:$0]  (!%p762_p5), %s137_s0, 128, %s139_s5, %s122_s12  }
  0x3f   : > { %147 = sbr.rel (%p769_p1) target bundleno = 285 (0x11d), region = 24  ;;  %s149_s20 = sand.u32 (!%p769_p1), 1, %s614_s17  }
  0x40   : > { %s351_s26 = sshll.u32 (!%p769_p1), %s149_s20, 3  ;;  %s150_s8 = scalar_lea.sflag (!%p769_p1), [#allocation5], %s149_s20 }
  0x41   : > { %s153_s11 = scalar_lea.vmem (!%p769_p1), [#allocation4], %s351_s26 }
  0x44   : > { %589 = dma.done.wait (%p729_p6), %s150_s8, 128  }
  0x45   : > { %591 = vsyncadd (%p729_p6), %s150_s8, 4294967168  ;;  %s170_s21 = sand.u32 1, %s602_s14   ;;  %p174_p8 = scmp.eq.s32.totalorder %s622_s18, 0 }
  0x46   : > { %s352_s0 = sshll.u32 %s170_s21, 3  ;;  %v641_v0 = vmov (%p174_p8), 0.0  }
  0x47   : > { %s797_s23 = scalar_lea.vmem [#allocation7], %s352_s0  ;;  %179 = sbr.rel (!%p174_p8) target bundleno = 76 (0x4c), region = 32 }
  0x48   : > { %180 = vst [vmem:[%s797_s23] sm:$0xff] (%p174_p8), %v641_v0 }
  0x4c PF: > { %s182_s29 = sld [smem:[#allocation3 + %s622_s18]]  ;;  %v184_v1 = vlaneseq  ;;  %v181_v6 = vld [vmem:[%s153_s11] sm:$0xff]  ;;  %vm201_vm2 = vcmask 130048   ;;  %s356_s4 = sshll.u32 %s626_s19, 3 }
  0x4d   : > { %s250_s12 = scalar_lea.hbm %s859_s2, %s356_s4  ;;  %s252_s27 = sshll.u32 %s797_s23, 4  ;;  %s253_s27 = int_to_ptr.vmem [resolvable:$true] %s252_s27 }
  0x4e   : > { %v185_v2 = vshrl.u32 %v184_v1, 7  ;;  %v190_v3 = vand.u32 127, %v184_v1  ;;  %s254_s28 = sshll.u32 %s250_s12, 4  ;;  %s240_s19 = scalar_lea.sflag [#allocation6], %s170_s21  ;;  %s255_s28 = int_to_ptr.hbm [resolvable:$true] %s254_s28 }
  0x4f   : > { %v229_v28 = vld [vmem:[%s797_s23] sm:$0xff]  ;;  %s528_s24 = sshra.s32 %s255_s28, 4  ;;  %s534_s26 = scalar_lea.hbm %s859_s2, 16  ;;  %s529_s24 = int_to_ptr.hbm [resolvable:$true] %s528_s24 }
  0x50   : > { %vm193_vm0 = vcmp.lt.s32.totalorder %v190_v3, 16  ;;  %vm230_vm8 = vcmp.eq.s32.totalorder %v185_v2, 0  ;;  %vm233_vm9 = vcmp.eq.s32.totalorder %v185_v2, 1  ;;  %s530_s3 = scalar_lea.hbm %s529_s24, 8  ;;  %p535_p4 = scmp.lt.s32.totalorder %s529_s24, %s859_s2 }
  0x51   : > { %p531_p6 = scmp.ne.s32.totalorder %s529_s24, %s530_s3  ;;  %p536_p9 = scmp.lt.s32.totalorder %s534_s26, %s530_s3 }
  0x52   : > { %s354_s30 = sshll.u32 %s182_s29, 3 }
  0x53   : > { %v186_v4 = vstv %s354_s30  ;;  %p532_p5 = pnand %p531_p6, %p746_p12  ;;  %p537_p10 = por %p536_p9, %p535_p4 }
  0x54   : > { %v187_v5 = vadd.s32 %v186_v4, %v185_v2 }
  0x55   : > { %p533_p1 = pneg %p532_p5 }
  0x56   : > { %vm194_vm1 = vcmp.lt.s32.totalorder %v187_v5, 3  ;;  %vm212_vm3 = vcmp.ge.s32.totalorder %v187_v5, 13  ;;  %vm213_vm4 = vcmp.lt.s32.totalorder %v187_v5, 16 }
  0x57   : > { %vm199_vm5 = vmand %vm194_vm1, %vm193_vm0  ;;  %p538_p11 = pnand %p537_p10, %p533_p1 }
  0x58   : > { %v200_v7 = vsel %vm199_vm5, %v181_v6, 0.0  ;;  %vm214_vm6 = vmand %vm212_vm3, %vm213_vm4 }
  0x59   : > { %v202_v8 = vsel %vm201_vm2, %v200_v7, 0.0  ;;  %vm217_vm7 = vmand %vm214_vm6, %vm193_vm0 }
  0x5a   : > { %203 = vadd.xlane.f32.xlu0 %v202_v8  ;;  %v218_v9 = vsel %vm217_vm7, %v181_v6, 0.0 }
  0x5b   : > { %v219_v10 = vsel %vm201_vm2, %v218_v9, 0.0 }
  0x62   : > { %220 = vadd.xlane.f32.xlu0 %v219_v10 }
  0xcd   : > { %v204_v11 = vpop.xlane.xlu0 %203 }
  0xce   : > { %v205_v12 = vrot.slane %v204_v11, 4 }
  0xd0   : > { %v206_v13 = vadd.f32 %v205_v12, %v204_v11 }
  0xd2   : > { %v207_v14 = vrot.slane %v206_v13, 2 }
  0xd4   : > { %v208_v15 = vadd.f32 %v207_v14, %v206_v13 }
  0xd5   : > { %v221_v16 = vpop.xlane.xlu0 %220 }
  0xd6   : > { %v222_v17 = vrot.slane %v221_v16, 4  ;;  %v209_v18 = vrot.slane %v208_v15, 1 }
  0xd8   : > { %v223_v19 = vadd.f32 %v222_v17, %v221_v16  ;;  %v210_v20 = vadd.f32 %v209_v18, %v208_v15 }
  0xda   : > { %v224_v21 = vrot.slane %v223_v19, 2  ;;  %360 = vpush %v210_v20 }
  0xdc   : > { %v225_v22 = vadd.f32 %v224_v21, %v223_v19 }
  0xde   : > { %v226_v23 = vrot.slane %v225_v22, 1 }
  0xe0   : > { %v227_v24 = vadd.f32 %v226_v23, %v225_v22 }
  0xe2   : > { %362 = vpush %v227_v24 }
 0x10b   : > { %s361_s18 = spop %360 }
 0x10c   : > { %v231_v25 = vstv %s361_s18 }
 0x10d   : > { %v232_v27 = vsel %vm230_vm8, %v231_v25, 0.0 }
 0x113   : > { %s363_s16 = spop %362 }
 0x114   : > { %v234_v26 = vstv %s363_s16 }
 0x115   : > { %v235_v29 = vsel %vm233_vm9, %v234_v26, 0.0 }
 0x116   : > { %v236_v30 = vadd.f32 %v235_v29, %v232_v27 }
 0x118   : > { %v237_v31 = vadd.f32 %v236_v30, %v229_v28 }
 0x11a   : > { %238 = vst [vmem:[%s797_s23] sm:$0xff] %v237_v31 }
 0x11b   : > { %541 = shalt.err (!%p538_p11)
}
 0x11c   : > { %368 = dma.vmem_to_hbm [thread:$0]  (%p746_p12), %s253_s27, 128, %s255_s28, %s240_s19  }
 0x11d PF: > { %p381_p13 = scmp.ge.s32.totalorder %s638_s22, 2  ;;  %s266_s21 = sand.u32 1, %s598_s13  }
 0x11e   : > { %s267_s0 = scalar_lea.sflag [#allocation6], %s266_s21 }
 0x11f   : > { %p377_p0 = pnand %p381_p13, %p755_p2 }
 0x121   : > { %p378_p3 = pneg %p377_p0 }
 0x123   : > { %593 = dma.done.wait (%p378_p3), %s267_s0, 128  }
 0x124   : > { %595 = vsyncadd (%p378_p3), %s267_s0, 4294967168  ;;  %s26_s22 = sadd.s32 1, %s638_s22   ;;  %s876_s9 = sld [smem:[#allocation13_spill]] }
 0x125   : > { %p23_p7 = scmp.ge.s32.totalorder %s26_s22, 6   ;;  %s877_s0 = sld [smem:[#allocation18_spill]] }
 0x126   : > { %s878_s18 = sld [smem:[#allocation14_spill]]  ;;  %s882_s13 = smov %s602_s14 }
 0x127   : > { %s879_s19 = sld [smem:[#allocation15_spill]]  ;;  %s883_s14 = smov %s606_s15 }
 0x128   : > { %s880_s20 = sld [smem:[#allocation16_spill]]  ;;  %s884_s15 = smov %s741_s7 }
 0x129   : > { %s881_s21 = sld [smem:[#allocation17_spill]]  ;;  %s885_s16 = smov %s614_s17 }
 0x12a   : > { %s886_s17 = smov %s876_s9  ;;  %25 = sbr.rel (!%p23_p7) target bundleno = 15 (0xf), region = 73 }
 0x12f   :  { %273 = vsyncpa [#allocation5], 1 }
 0x130   :  { %275 = vsyncpa [#allocation5 + $0x1], 1 }
 0x131   :  { %276 = vsyncpa [#allocation6], 1 }
 0x132   :  { %278 = vsyncpa [#allocation6 + $0x1], 1 }

</bundles_post_ra>
